<compile_context>
chip_gen: v6e
topology: v6e:2x2x1
jax: 0.10.0
libtpu: 0.0.40
codegen_flags: <defaults>
</compile_context>

<pallas_src>
import functools

import jax
import jax.numpy as jnp
from jax.experimental import pallas as pl
from jax.experimental.pallas import tpu as pltpu

BN_EPS = 1e-3
LEAKY_SLOPE = 0.2
H1 = 512
H2 = 256
LANE = 128
MAX_TK = 2048          # cap on the layer-1 reduction (input-feature) tile


def _round_up(x, m):
    return (x + m - 1) // m * m


def _k_tiling(input_dim):
    """Layer-1 K tile and padded feature count.  Single tile for small dims."""
    tk = input_dim if input_dim <= MAX_TK else MAX_TK
    d_pad = _round_up(input_dim, tk)
    return tk, d_pad


def _leaky_relu(x):
    return jnp.where(x > 0, x, LEAKY_SLOPE * x)


def discriminator_kernel(x_ref, w1_ref, b1_ref, w2_ref, b2_ref, w3_ref, b3_ref,
                         out_ref, acc_ref):
    k = pl.program_id(1)

    @pl.when(k == 0)
    def _init():
        acc_ref[...] = jnp.zeros_like(acc_ref)

    # Layer-1 partial matmul over this K (input-feature) tile.  x arrives f32
    # straight from HBM; the bf16 cast runs on the VPU, hidden under the MXU.
    acc_ref[...] += jnp.dot(x_ref[...].astype(w1_ref.dtype), w1_ref[...],
                            preferred_element_type=jnp.float32)

    @pl.when(k == pl.num_programs(1) - 1)
    def _finish():
        # Layer 1 epilogue (BN pre-folded bias) + LeakyReLU.  Dropout = identity.
        h = _leaky_relu(acc_ref[...] + b1_ref[...])
        # Layer 2: Linear (BN pre-folded) + LeakyReLU.  Dropout = identity.
        h = jnp.dot(h.astype(w2_ref.dtype), w2_ref[...],
                    preferred_element_type=jnp.float32) + b2_ref[...]
        h = _leaky_relu(h)
        # Layer 3: validity logits, lane-padded to 128 columns -> unmasked vst.
        v = jnp.dot(h.astype(w3_ref.dtype), w3_ref[...],
                    preferred_element_type=jnp.float32) + b3_ref[...]
        out_ref[...] = v


def init_params(key, input_dim, n_batch_gan):
    out_dim = 1 + n_batch_gan
    ks = jax.random.split(key, 8)

    def lin(kw, kb, fan_in, fan_out):
        bound = 1.0 / jnp.sqrt(jnp.float32(fan_in))
        w = jax.random.uniform(kw, (fan_in, fan_out), jnp.float32, -bound, bound)
        b = jax.random.uniform(kb, (1, fan_out), jnp.float32, -bound, bound)
        return w, b

    w1, b1 = lin(ks[0], ks[1], input_dim, H1)
    w2, b2 = lin(ks[2], ks[3], H1, H2)
    w3, b3 = lin(ks[4], ks[5], H2, out_dim)

    def bn(km, n):
        gamma = jnp.ones((1, n), jnp.float32)
        beta = jnp.zeros((1, n), jnp.float32)
        mean = 0.1 * jax.random.normal(km, (1, n), jnp.float32)
        var = jnp.ones((1, n), jnp.float32)
        return gamma, beta, mean, var

    g1, be1, m1, v1 = bn(ks[6], H1)
    g2, be2, m2, v2 = bn(ks[7], H2)

    return dict(
        w1=w1, b1=b1, g1=g1, be1=be1, m1=m1, v1=v1,
        w2=w2, b2=b2, g2=g2, be2=be2, m2=m2, v2=v2,
        w3=w3, b3=b3,
    )


def fold_params(params, n_batch_gan, compute_dtype=jnp.bfloat16):
    """Fold eval-mode BatchNorm into the linears; pad layer-3 output to 128
    lanes and layer-1 input rows to the K-tiling grid (zero rows are inert)."""
    out_dim = 1 + n_batch_gan
    out_pad = _round_up(out_dim, LANE)
    input_dim = params["w1"].shape[0]
    _, d_pad = _k_tiling(input_dim)

    s1 = params["g1"] / jnp.sqrt(params["v1"] + BN_EPS)              # (1, H1)
    w1 = params["w1"] * s1                                            # (D, H1)
    b1 = (params["b1"] - params["m1"]) * s1 + params["be1"]           # (1, H1)
    if d_pad != input_dim:
        w1 = jnp.pad(w1, ((0, d_pad - input_dim), (0, 0)))            # zero rows

    s2 = params["g2"] / jnp.sqrt(params["v2"] + BN_EPS)
    w2 = params["w2"] * s2
    b2 = (params["b2"] - params["m2"]) * s2 + params["be2"]

    w3 = jnp.pad(params["w3"], ((0, 0), (0, out_pad - out_dim)))
    b3 = jnp.pad(params["b3"], ((0, 0), (0, out_pad - out_dim)))

    return dict(
        w1=w1.astype(compute_dtype), b1=b1.astype(jnp.float32),
        w2=w2.astype(compute_dtype), b2=b2.astype(jnp.float32),
        w3=w3.astype(compute_dtype), b3=b3.astype(jnp.float32),
    )


@functools.partial(jax.jit, static_argnames=("n_batch_gan", "tb"))
def discriminator_forward(x, folded, *, n_batch_gan, tb=256):
    B, D = x.shape
    out_dim = 1 + n_batch_gan
    out_pad = folded["w3"].shape[1]

    # ---- layer-1 K tiling (feature dim) -------------------------------------
    tk, d_pad = _k_tiling(D)
    assert folded["w1"].shape[0] == d_pad, "fold_params / forward K-tiling mismatch"
    if d_pad != D:
        # Only for large, non-tile-aligned input_dim; padded zero columns meet
        # zero rows in w1, so they contribute nothing to the reduction.
        x = jnp.pad(x, ((0, 0), (0, d_pad - D)))
    nk = d_pad // tk

    # ---- batch tiling --------------------------------------------------------
    # tb=256 fills the 256-row MXU on v6e/v7x (pass tb=128 on v5e).  For small
    # batches, split into >=2 grid steps so both v7x TensorCores get work.
    if B >= 8:
        tb_eff = min(tb, _round_up(B, 8))
        if B > 8 and pl.cdiv(B, tb_eff) < 2:
            tb_eff = _round_up(pl.cdiv(B, 2), 8)
    else:
        tb_eff = B                      # tiny batch: one whole-batch block
    nb = pl.cdiv(B, tb_eff)             # trailing partial block is masked

    # ---- VMEM budget (double-buffered inputs/outputs + f32 accumulator) -----
    vmem_bytes = 2 * (tb_eff * tk * 4            # x tile (f32)
                      + tk * H1 * 2              # w1 tile (bf16)
                      + H1 * 4                   # b1
                      + H1 * H2 * 2 + H2 * 4     # w2, b2
                      + H2 * out_pad * 2 + out_pad * 4   # w3, b3
                      + tb_eff * out_pad * 4)    # out tile (f32)
    vmem_bytes += tb_eff * H1 * 4                # layer-1 accumulator scratch
    vmem_limit = int(min(max(vmem_bytes + (16 << 20), 32 << 20), 64 << 20))

    cost = pl.CostEstimate(
        flops=2 * B * (D * H1 + H1 * H2 + H2 * out_pad),
        transcendentals=0,
        bytes_accessed=(B * d_pad * 4 + d_pad * H1 * 2 + H1 * H2 * 2
                        + H2 * out_pad * 2 + B * out_pad * 4),
    )

    grid_spec = pltpu.PrefetchScalarGridSpec(
        num_scalar_prefetch=0,
        grid=(nb, nk),                           # reduction (K) axis last
        in_specs=[
            pl.BlockSpec((tb_eff, tk), lambda i, k: (i, k)),     # x tile (f32)
            pl.BlockSpec((tk, H1), lambda i, k: (k, 0)),         # w1 K tile
            pl.BlockSpec((1, H1), lambda i, k: (0, 0)),          # b1 (resident)
            pl.BlockSpec((H1, H2), lambda i, k: (0, 0)),         # w2 (resident)
            pl.BlockSpec((1, H2), lambda i, k: (0, 0)),          # b2 (resident)
            pl.BlockSpec((H2, out_pad), lambda i, k: (0, 0)),    # w3 (resident)
            pl.BlockSpec((1, out_pad), lambda i, k: (0, 0)),     # b3 (resident)
        ],
        out_specs=pl.BlockSpec((tb_eff, out_pad), lambda i, k: (i, 0)),
        scratch_shapes=[pltpu.VMEM((tb_eff, H1), jnp.float32)],  # layer-1 acc
    )

    validity_pad = pl.pallas_call(
        discriminator_kernel,
        out_shape=jax.ShapeDtypeStruct((B, out_pad), jnp.float32),
        grid_spec=grid_spec,
        compiler_params=pltpu.CompilerParams(
            dimension_semantics=("parallel", "arbitrary"),
            vmem_limit_bytes=vmem_limit),
        cost_estimate=cost,
    )(
        x,
        folded["w1"], folded["b1"],
        folded["w2"], folded["b2"],
        folded["w3"], folded["b3"],
    )

    validity = validity_pad[:, :out_dim]
    if n_batch_gan == 0:
        return jax.nn.sigmoid(validity), None
    return jax.nn.sigmoid(validity[:, :1]), validity[:, 1:]


def reference_forward_folded(x, f, n_batch_gan, out_dim):
    """Mirrors the kernel's bf16-operand / f32-accumulate math (tight check)."""
    w1 = f["w1"][: x.shape[1]]
    h = jnp.dot(x.astype(w1.dtype), w1,
                preferred_element_type=jnp.float32) + f["b1"]
    h = _leaky_relu(h)
    h = jnp.dot(h.astype(f["w2"].dtype), f["w2"],
                preferred_element_type=jnp.float32) + f["b2"]
    h = _leaky_relu(h)
    v = jnp.dot(h.astype(f["w3"].dtype), f["w3"],
                preferred_element_type=jnp.float32) + f["b3"]
    v = v[:, :out_dim]
    if n_batch_gan == 0:
        return jax.nn.sigmoid(v), None
    return jax.nn.sigmoid(v[:, :1]), v[:, 1:]


def reference_forward_f32(x, p, n_batch_gan):
    """Exact eval-mode f32 semantics of the PyTorch module (loose check)."""
    h = x @ p["w1"] + p["b1"]
    h = (h - p["m1"]) * (p["g1"] / jnp.sqrt(p["v1"] + BN_EPS)) + p["be1"]
    h = _leaky_relu(h)
    h = h @ p["w2"] + p["b2"]
    h = (h - p["m2"]) * (p["g2"] / jnp.sqrt(p["v2"] + BN_EPS)) + p["be2"]
    h = _leaky_relu(h)
    v = h @ p["w3"] + p["b3"]
    if n_batch_gan == 0:
        return jax.nn.sigmoid(v), None
    return jax.nn.sigmoid(v[:, :1]), v[:, 1:]


if __name__ == "__main__":
    key = jax.random.PRNGKey(0)
    k_x, k_p, k_p0 = jax.random.split(key, 3)

    batch = 16
    input_dim = 64
    n_batch_gan = 3          # -> output dim 1 + 3 = 4

    x = jax.random.normal(k_x, (batch, input_dim), jnp.float32)
    params = init_params(k_p, input_dim, n_batch_gan)
    folded = fold_params(params, n_batch_gan)

    out1, out2 = discriminator_forward(x, folded, n_batch_gan=n_batch_gan)
    jax.block_until_ready((out1, out2))

    assert out1.shape == (batch, 1) and out2.shape == (batch, n_batch_gan)

    # Tight check against a pure-JAX reference using the same bf16 folded params.
    r1, r2 = reference_forward_folded(x, folded, n_batch_gan, 1 + n_batch_gan)
    assert jnp.allclose(out1, r1, atol=1e-3, rtol=1e-3)
    assert jnp.allclose(out2, r2, atol=1e-3, rtol=1e-3)

    # Loose sanity check against exact f32 eval-mode PyTorch semantics
    # (bf16 matmul operands introduce ~1e-2 level error).
    f1, f2 = reference_forward_f32(x, params, n_batch_gan)
    assert jnp.allclose(out1, f1, atol=6e-2)
    assert jnp.allclose(out2, f2, atol=6e-2)

    # Also exercise the n_batch_gan == 0 branch.
    params0 = init_params(k_p0, input_dim, 0)
    folded0 = fold_params(params0, 0)
    o1, o2 = discriminator_forward(x, folded0, n_batch_gan=0)
    jax.block_until_ready(o1)
    assert o1.shape == (batch, 1) and o2 is None
    g1, _ = reference_forward_f32(x, params0, 0)
    assert jnp.allclose(o1, g1, atol=6e-2)

    print("KERNEL_OK")
</pallas_src>

<mosaic_0001>
module attributes {stable_mosaic.version = 11 : i64} {
  func.func @discriminator_kernel(%arg0: i32, %arg1: i32, %arg2: memref<8x64xf32, #tpu.memory_space<vmem>>, %arg3: memref<64x512xbf16, #tpu.memory_space<vmem>>, %arg4: memref<1x512xf32, #tpu.memory_space<vmem>>, %arg5: memref<512x256xbf16, #tpu.memory_space<vmem>>, %arg6: memref<1x256xf32, #tpu.memory_space<vmem>>, %arg7: memref<256x128xbf16, #tpu.memory_space<vmem>>, %arg8: memref<1x128xf32, #tpu.memory_space<vmem>>, %arg9: memref<8x128xf32, #tpu.memory_space<vmem>>, %arg10: memref<8x512xf32, #tpu.memory_space<vmem>>) attributes {dimension_semantics = [#tpu.dimension_semantics<parallel>, #tpu.dimension_semantics<arbitrary>], iteration_bounds = array<i64: 2, 1>, scalar_prefetch = 0 : i64, scratch_operands = 1 : i64, tpu.core_type = #tpu.core_type<tc>, window_params = [{transform_indices = @transform_0, window_bounds = array<i64: 8, 64>}, {transform_indices = @transform_1, window_bounds = array<i64: 64, 512>}, {pipeline_mode = #tpu.pipeline_mode<synchronous>, transform_indices = @transform_2, window_bounds = array<i64: 1, 512>}, {pipeline_mode = #tpu.pipeline_mode<synchronous>, transform_indices = @transform_3, window_bounds = array<i64: 512, 256>}, {pipeline_mode = #tpu.pipeline_mode<synchronous>, transform_indices = @transform_4, window_bounds = array<i64: 1, 256>}, {pipeline_mode = #tpu.pipeline_mode<synchronous>, transform_indices = @transform_5, window_bounds = array<i64: 256, 128>}, {pipeline_mode = #tpu.pipeline_mode<synchronous>, transform_indices = @transform_6, window_bounds = array<i64: 1, 128>}, {transform_indices = @transform_7, window_bounds = array<i64: 8, 128>}]} {
    %c0_i32 = arith.constant 0 : i32
    %0 = arith.cmpi eq, %arg1, %c0_i32 : i32
    %1 = arith.extui %0 : i1 to i32
    %c0_i32_0 = arith.constant 0 : i32
    %2 = arith.cmpi ne, %1, %c0_i32_0 : i32
    scf.if %2 {
      %cst_10 = arith.constant 0.000000e+00 : f32
      %13 = vector.broadcast %cst_10 : f32 to vector<8x512xf32>
      %c0_11 = arith.constant 0 : index
      %c0_12 = arith.constant 0 : index
      %14 = vector.load %arg10[%c0_11, %c0_12] : memref<8x512xf32, #tpu.memory_space<vmem>>, vector<8x512xf32>
      tpu.vector_store %arg10[%c0_11, %c0_12], %13 {strides = array<i32>} : memref<8x512xf32, #tpu.memory_space<vmem>>, vector<8x512xf32>,
    } else {
    }
    %c0 = arith.constant 0 : index
    %c0_1 = arith.constant 0 : index
    %3 = vector.load %arg10[%c0, %c0_1] : memref<8x512xf32, #tpu.memory_space<vmem>>, vector<8x512xf32>
    %c0_2 = arith.constant 0 : index
    %c0_3 = arith.constant 0 : index
    %4 = vector.load %arg2[%c0_2, %c0_3] : memref<8x64xf32, #tpu.memory_space<vmem>>, vector<8x64xf32>
    %5 = arith.truncf %4 : vector<8x64xf32> to vector<8x64xbf16>
    %c0_4 = arith.constant 0 : index
    %c0_5 = arith.constant 0 : index
    %6 = vector.load %arg3[%c0_4, %c0_5] : memref<64x512xbf16, #tpu.memory_space<vmem>>, vector<64x512xbf16>
    %cst = arith.constant dense<0.000000e+00> : vector<8x512xf32>
    %7 = tpu.matmul %5, %6, %cst {dimension_numbers = #tpu.dot_dimension_numbers<[1], [0], [0], [1], [0, 0, 1, 1], [], []>} : vector<8x64xbf16>, vector<64x512xbf16>, vector<8x512xf32> -> vector<8x512xf32>
    %8 = arith.addf %3, %7 : vector<8x512xf32>
    %c0_6 = arith.constant 0 : index
    %c0_7 = arith.constant 0 : index
    %9 = vector.load %arg10[%c0_6, %c0_7] : memref<8x512xf32, #tpu.memory_space<vmem>>, vector<8x512xf32>
    tpu.vector_store %arg10[%c0_6, %c0_7], %8 {strides = array<i32>} : memref<8x512xf32, #tpu.memory_space<vmem>>, vector<8x512xf32>,
    %c0_i32_8 = arith.constant 0 : i32
    %10 = arith.cmpi eq, %arg1, %c0_i32_8 : i32
    %11 = arith.extui %10 : i1 to i32
    %c0_i32_9 = arith.constant 0 : i32
    %12 = arith.cmpi ne, %11, %c0_i32_9 : i32
    scf.if %12 {
      %c0_10 = arith.constant 0 : index
      %c0_11 = arith.constant 0 : index
      %13 = vector.load %arg10[%c0_10, %c0_11] : memref<8x512xf32, #tpu.memory_space<vmem>>, vector<8x512xf32>
      %c0_12 = arith.constant 0 : index
      %c0_13 = arith.constant 0 : index
      %14 = vector.load %arg4[%c0_12, %c0_13] : memref<1x512xf32, #tpu.memory_space<vmem>>, vector<1x512xf32>
      %15 = vector.broadcast %14 : vector<1x512xf32> to vector<8x512xf32>
      %16 = arith.addf %13, %15 : vector<8x512xf32>
      %cst_14 = arith.constant 0.000000e+00 : f32
      %17 = vector.broadcast %cst_14 : f32 to vector<8x512xf32>
      %18 = arith.cmpf ogt, %16, %17 : vector<8x512xf32>
      %cst_15 = arith.constant 2.000000e-01 : f32
      %19 = vector.broadcast %cst_15 : f32 to vector<8x512xf32>
      %20 = arith.mulf %19, %16 : vector<8x512xf32>
      %21 = arith.select %18, %16, %20 : vector<8x512xi1>, vector<8x512xf32>
      %22 = arith.truncf %21 : vector<8x512xf32> to vector<8x512xbf16>
      %c0_16 = arith.constant 0 : index
      %c0_17 = arith.constant 0 : index
      %23 = vector.load %arg5[%c0_16, %c0_17] : memref<512x256xbf16, #tpu.memory_space<vmem>>, vector<512x256xbf16>
      %cst_18 = arith.constant dense<0.000000e+00> : vector<8x256xf32>
      %24 = tpu.matmul %22, %23, %cst_18 {dimension_numbers = #tpu.dot_dimension_numbers<[1], [0], [0], [1], [0, 0, 1, 1], [], []>} : vector<8x512xbf16>, vector<512x256xbf16>, vector<8x256xf32> -> vector<8x256xf32>
      %c0_19 = arith.constant 0 : index
      %c0_20 = arith.constant 0 : index
      %25 = vector.load %arg6[%c0_19, %c0_20] : memref<1x256xf32, #tpu.memory_space<vmem>>, vector<1x256xf32>
      %26 = vector.broadcast %25 : vector<1x256xf32> to vector<8x256xf32>
      %27 = arith.addf %24, %26 : vector<8x256xf32>
      %cst_21 = arith.constant 0.000000e+00 : f32
      %28 = vector.broadcast %cst_21 : f32 to vector<8x256xf32>
      %29 = arith.cmpf ogt, %27, %28 : vector<8x256xf32>
      %cst_22 = arith.constant 2.000000e-01 : f32
      %30 = vector.broadcast %cst_22 : f32 to vector<8x256xf32>
      %31 = arith.mulf %30, %27 : vector<8x256xf32>
      %32 = arith.select %29, %27, %31 : vector<8x256xi1>, vector<8x256xf32>
      %33 = arith.truncf %32 : vector<8x256xf32> to vector<8x256xbf16>
      %c0_23 = arith.constant 0 : index
      %c0_24 = arith.constant 0 : index
      %34 = vector.load %arg7[%c0_23, %c0_24] : memref<256x128xbf16, #tpu.memory_space<vmem>>, vector<256x128xbf16>
      %cst_25 = arith.constant dense<0.000000e+00> : vector<8x128xf32>
      %35 = tpu.matmul %33, %34, %cst_25 {dimension_numbers = #tpu.dot_dimension_numbers<[1], [0], [0], [1], [0, 0, 1, 1], [], []>} : vector<8x256xbf16>, vector<256x128xbf16>, vector<8x128xf32> -> vector<8x128xf32>
      %c0_26 = arith.constant 0 : index
      %c0_27 = arith.constant 0 : index
      %36 = vector.load %arg8[%c0_26, %c0_27] : memref<1x128xf32, #tpu.memory_space<vmem>>, vector<1x128xf32>
      %37 = vector.broadcast %36 : vector<1x128xf32> to vector<8x128xf32>
      %38 = arith.addf %35, %37 : vector<8x128xf32>
      %c0_28 = arith.constant 0 : index
      %c0_29 = arith.constant 0 : index
      %39 = vector.load %arg9[%c0_28, %c0_29] : memref<8x128xf32, #tpu.memory_space<vmem>>, vector<8x128xf32>
      tpu.vector_store %arg9[%c0_28, %c0_29], %38 {strides = array<i32>} : memref<8x128xf32, #tpu.memory_space<vmem>>, vector<8x128xf32>,
    } else {
    }
    return
  }
  func.func @transform_0(%arg0: i32, %arg1: i32) -> (i32, i32) {
    %c0_i32 = arith.constant 0 : i32
    return %arg0, %arg1 : i32, i32
  }
  func.func @transform_1(%arg0: i32, %arg1: i32) -> (i32, i32) {
    %c0_i32 = arith.constant 0 : i32
    %c0_i32_0 = arith.constant 0 : i32
    return %arg1, %c0_i32 : i32, i32
  }
  func.func @transform_2(%arg0: i32, %arg1: i32) -> (i32, i32) {
    %c0_i32 = arith.constant 0 : i32
    %c0_i32_0 = arith.constant 0 : i32
    %c0_i32_1 = arith.constant 0 : i32
    return %c0_i32, %c0_i32_0 : i32, i32
  }
  func.func @transform_3(%arg0: i32, %arg1: i32) -> (i32, i32) {
    %c0_i32 = arith.constant 0 : i32
    %c0_i32_0 = arith.constant 0 : i32
    %c0_i32_1 = arith.constant 0 : i32
    return %c0_i32, %c0_i32_0 : i32, i32
  }
  func.func @transform_4(%arg0: i32, %arg1: i32) -> (i32, i32) {
    %c0_i32 = arith.constant 0 : i32
    %c0_i32_0 = arith.constant 0 : i32
    %c0_i32_1 = arith.constant 0 : i32
    return %c0_i32, %c0_i32_0 : i32, i32
  }
  func.func @transform_5(%arg0: i32, %arg1: i32) -> (i32, i32) {
    %c0_i32 = arith.constant 0 : i32
    %c0_i32_0 = arith.constant 0 : i32
    %c0_i32_1 = arith.constant 0 : i32
    return %c0_i32, %c0_i32_0 : i32, i32
  }
  func.func @transform_6(%arg0: i32, %arg1: i32) -> (i32, i32) {
    %c0_i32 = arith.constant 0 : i32
    %c0_i32_0 = arith.constant 0 : i32
    %c0_i32_1 = arith.constant 0 : i32
    return %c0_i32, %c0_i32_0 : i32, i32
  }
  func.func @transform_7(%arg0: i32, %arg1: i32) -> (i32, i32) {
    %c0_i32 = arith.constant 0 : i32
    %c0_i32_0 = arith.constant 0 : i32
    return %arg0, %c0_i32 : i32, i32
  }
}

</mosaic_0001>

<bundles_post_ra>
// kernel: discriminator_forward.1
= control target key start
LH: loop header
LB: loop body
LE: loop exit
PB: predicated region body
PF: predicated region fallthrough
CT: control target
= control target key end

     0   :  { %s2211_s0 = inlined_call_operand.hbm [shape: f32[16,64], index: 0, kind: input, shape index: {}]   ;;  %s2212_s1 = inlined_call_operand.hbm [shape: bf16[64,512], index: 1, kind: input, shape index: {}]   ;;  %s2213_s2 = inlined_call_operand.hbm [shape: f32[1,512], index: 2, kind: input, shape index: {}]   ;;  %s2214_s3 = inlined_call_operand.hbm [shape: bf16[512,256], index: 3, kind: input, shape index: {}]   ;;  %s2215_s4 = inlined_call_operand.vmem [shape: f32[1,256], index: 4, kind: input, shape index: {}]   ;;  %s2216_s5 = inlined_call_operand.hbm [shape: bf16[256,128], index: 5, kind: input, shape index: {}]   ;;  %s2217_s6 = inlined_call_operand.vmem [shape: f32[1,128], index: 6, kind: input, shape index: {}]   ;;  %s2218_s7 = inlined_call_operand.vmem [shape: f32[16,128], index: 7, kind: output, shape index: {}]  }
   0x1   :  { %2222 = sst [smem:[#allocation14_spill]] %s2212_s1 }
   0x2   :  { %12 = vsyncpa [#allocation4], 0 }
   0x3   :  { %14 = vsyncpa [#allocation4 + $0x1], 0 }
   0x4   :  { %15 = vsyncpa [#allocation6], 0 }
   0x5   :  { %16 = vsyncpa [#allocation9], 0  ;;  %s2028_s24 = smov 0   ;;  %s2030_s25 = smov 0  }
   0x6   :  { %s2032_s26 = smov 0   ;;  %s2034_s27 = smov 0  }
   0x7   :  { %s2036_s28 = smov 0   ;;  %s2038_s29 = smov 0  }
   0x8 LB: > { %s1405_s30 = sadd.s32 4294967295, %s1974_s29   ;;  %p1407_p0 = scmp.ge.s32.totalorder %s1974_s29, 1  ;;  %s1974_s29 = sphi %s2038_s29, %s22_s29   ;;  %s1970_s28 = sphi %s2036_s28, %s2237_s28   ;;  %s1966_s27 = sphi %s2034_s27, %s2236_s27   ;;  %s1962_s26 = sphi %s2032_s26, %s2235_s26   ;;  %s1958_s25 = sphi %s2030_s25, %s2234_s25   ;;  %s1954_s24 = sphi %s2028_s24, %s2233_s24  }
   0x9   : > { %p2060_p1 = scmp.eq.s32.totalorder %s1405_s30, 0  ;;  %p224_p2 = scmp.lt.s32.totalorder %s1974_s29, 3 }
   0xa   : > { %s1976_s10 = smov [#allocation5]   ;;  %s1977_s13 = smov [#allocation8]  }
   0xb   : > { %s2223_s8 = scalar_select %p2060_p1, 1, 0 }
   0xc   : > { %p2065_p3 = pnand %p1407_p0, %p224_p2  ;;  %s240_s11 = sshll.u32 %s1976_s10, 4  ;;  %s241_s11 = int_to_ptr.vmem [resolvable:$true] %s240_s11 }
   0xd   : > { %s264_s14 = sshll.u32 %s1977_s13, 4  ;;  %s1795_s15 = scalar_lea.vmem %s241_s11, 2048  ;;  %s265_s14 = int_to_ptr.vmem [resolvable:$true] %s264_s14 }
   0xe   : > { %s2224_s9 = scalar_select %p2065_p3, 1, 0 }
   0xf   : > { %p1563_p4 = pneg %p2065_p3  ;;  %p1796_p7 = scmp.ne.s32.totalorder %s241_s11, %s1795_s15 }
  0x10   : > { %p1803_p10 = scmp.lt.s32.totalorder %s241_s11, %s241_s11  ;;  %p1804_p11 = scmp.lt.s32.totalorder %s1795_s15, %s1795_s15 }
  0x11   : > { %p2073_p5 = pnand %p1563_p4, %p2060_p1 }
  0x12   : > { %p1805_p12 = por %p1804_p11, %p1803_p10 }
  0x13   : > { %p1786_p6 = pneg %p2073_p5 }
  0x15   : > { %p1798_p8 = pnand %p1796_p7, %p1786_p6 }
  0x17   : > { %p1799_p9 = pneg %p1798_p8 }
  0x19   : > { %p1806_p13 = pnand %p1805_p12, %p1799_p9 }
  0x1b   : > { %1809 = shalt.err (!%p1806_p13)
}
  0x1c   : > { %s1978_s16 = smov 256   ;;  %s1979_s17 = smov 16  }
  0x1d   : > { %s2226_s1 = sld [smem:[#allocation14_spill]]  ;;  %s1821_s20 = scalar_lea.vmem %s265_s14, 8192 }
  0x1e   : > { %p1822_p0 = scmp.ne.s32.totalorder %s265_s14, %s1821_s20  ;;  %p1829_p7 = scmp.lt.s32.totalorder %s265_s14, %s265_s14 }
  0x1f   : > { %p1830_p8 = scmp.lt.s32.totalorder %s1821_s20, %s1821_s20 }
  0x20   : > { %p1824_p2 = pnand %p1822_p0, %p1786_p6 }
  0x21   : > { %p1831_p10 = por %p1830_p8, %p1829_p7 }
  0x22   : > { %p1825_p4 = pneg %p1824_p2 }
  0x23   : > { %1566 = dma.hbm_to_vmem [thread:$0]  (!%p2073_p5), %s2226_s1, 2048, %s241_s11, [#allocation6], %s1978_s16, %s1978_s16, %s1979_s17  }
  0x24   : > { %p1832_p9 = pnand %p1831_p10, %p1825_p4 }
  0x26   : > { %1835 = shalt.err (!%p1832_p9)
}
  0x27   : > { %s1980_s21 = smov 128   ;;  %s1981_s22 = smov 8  }
  0x28   : > { %1572 = dma.hbm_to_vmem [thread:$0]  (!%p2073_p5), %s2214_s3, 8192, %s265_s14, [#allocation9], %s1980_s21, %s1980_s21, %s1981_s22  }
  0x29   : > { %s1982_s10 = smov [#allocation7]   ;;  %s1983_s13 = smov [#allocation10]  }
  0x2a   : > { %s254_s11 = sshll.u32 %s1982_s10, 4  ;;  %s280_s15 = sshll.u32 %s1983_s13, 4  ;;  %s255_s11 = int_to_ptr.vmem [resolvable:$true] %s254_s11  ;;  %s281_s15 = int_to_ptr.vmem [resolvable:$true] %s280_s15 }
  0x2b   : > { %s1847_s16 = scalar_lea.vmem %s255_s11, 64  ;;  %p1855_p0 = scmp.lt.s32.totalorder %s255_s11, %s255_s11 }
  0x2c   : > { %p1848_p11 = scmp.ne.s32.totalorder %s255_s11, %s1847_s16  ;;  %p1856_p2 = scmp.lt.s32.totalorder %s1847_s16, %s1847_s16 }
  0x2e   : > { %p1850_p12 = pnand %p1848_p11, %p1786_p6  ;;  %p1857_p4 = por %p1856_p2, %p1855_p0 }
  0x30   : > { %p1851_p13 = pneg %p1850_p12 }
  0x32   : > { %p1858_p7 = pnand %p1857_p4, %p1851_p13 }
  0x34   : > { %1861 = shalt.err (!%p1858_p7)
}
  0x35   : > { %1569 = dma.hbm_to_vmem [thread:$0]  (!%p2073_p5), %s2213_s2, 64, %s255_s11, [#allocation6]  }
  0x36   : > { %s1873_s18 = scalar_lea.vmem %s281_s15, 2048  ;;  %p1881_p11 = scmp.lt.s32.totalorder %s281_s15, %s281_s15 }
  0x37   : > { %p1874_p8 = scmp.ne.s32.totalorder %s281_s15, %s1873_s18  ;;  %p1882_p12 = scmp.lt.s32.totalorder %s1873_s18, %s1873_s18 }
  0x39   : > { %p1876_p10 = pnand %p1874_p8, %p1786_p6  ;;  %p1883_p3 = por %p1882_p12, %p1881_p11 }
  0x3b   : > { %p1877_p9 = pneg %p1876_p10 }
  0x3d   : > { %p1884_p1 = pnand %p1883_p3, %p1877_p9 }
  0x3f   : > { %1887 = shalt.err (!%p1884_p1)
}
  0x40   : > { %s1984_s19 = smov 64   ;;  %s1985_s20 = smov 4  }
  0x41   : > { %1575 = dma.hbm_to_vmem [thread:$0]  (!%p2073_p5), %s2216_s5, 2048, %s281_s15, [#allocation9], %s1984_s19, %s1984_s19, %s1985_s20  }
  0x42   : > { %s34_s23 = sadd.s32 1, %s1970_s28  ;;  %s43_s30 = sadd.s32 1, %s1962_s26 }
  0x43   : > { %p36_p1 = scmp.ge.s32.totalorder %s34_s23, 2  ;;  %p50_p3 = scmp.ne.s32.totalorder %s1962_s26, %s1958_s25 }
  0x44   : > { %p51_p6 = scmp.eq.s32.totalorder %s1974_s29, 0  ;;  %p56_p13 = scmp.ne.s32.totalorder %s1958_s25, %s1954_s24 }
  0x45   : > { %s2239_s23 = smov (%p36_p1, %s34_s23), 0  ;;  %p2228_p2 = scmp.ne.s32.totalorder %s2223_s8, 0 }
  0x46   : > { %p2120_p0 = por %p51_p6, %p50_p3  ;;  %s38_s11 = ssub.s32 %s1970_s28, %s2239_s23 }
  0x47   : > { %p2126_p4 = por %p2228_p2, %p56_p13  ;;  %p1584_p5 = scmp.lt.s32.totalorder %s1974_s29, 2 }
  0x48   : > { %p41_p7 = scmp.eq.s32.totalorder %s38_s11, 0  ;;  %s297_s13 = sand.u32 1, %s1962_s26  }
  0x49   : > { %s1413_s15 = sshll.u32 %s297_s13, 3  ;;  %s1414_s24 = sshll.u32 %s1970_s28, 7 }
  0x4a   : > { %s2135_s16 = scalar_select %p41_p7, %s1962_s26, %s43_s30  }
  0x4b   : > { %s307_s18 = scalar_lea.hbm %s2211_s0, %s1414_s24  ;;  %s301_s19 = scalar_lea.vmem [#allocation3], %s1413_s15 }
  0x4c   : > { %s309_s20 = sshll.u32 %s301_s19, 4  ;;  %p2143_p8 = pnand %p1584_p5, %p2120_p0  ;;  %s310_s20 = int_to_ptr.vmem [resolvable:$true] %s309_s20 }
  0x4d   : > { %s298_s22 = scalar_lea.sflag [#allocation4], %s297_s13  ;;  %s1901_s11 = scalar_lea.vmem %s310_s20, 128 }
  0x4e   : > { %p1890_p10 = pneg %p2143_p8  ;;  %p1902_p9 = scmp.ne.s32.totalorder %s310_s20, %s1901_s11 }
  0x4f   : > { %s1986_s30 = smov [#allocation3]  }
  0x50   : > { %p1904_p11 = pnand %p1902_p9, %p1890_p10  ;;  %s1906_s1 = sshll.u32 %s1986_s30, 4  ;;  %s1907_s1 = int_to_ptr.vmem [resolvable:$false] %s1906_s1 }
  0x51   : > { %s1908_s24 = scalar_lea.vmem %s1907_s1, 256  ;;  %p1909_p1 = scmp.lt.s32.totalorder %s310_s20, %s1907_s1 }
  0x52   : > { %p1905_p12 = pneg %p1904_p11  ;;  %p1910_p3 = scmp.lt.s32.totalorder %s1908_s24, %s1901_s11 }
  0x54   : > { %p1911_p6 = por %p1910_p3, %p1909_p1 }
  0x56   : > { %p1912_p13 = pnand %p1911_p6, %p1905_p12 }
  0x58   : > { %1915 = shalt.err (!%p1912_p13)
}
  0x59   : > { %1579 = dma.hbm_to_vmem [thread:$0]  (!%p2143_p8), %s307_s18, 128, %s310_s20, %s298_s22  }
  0x5a   : > { %p2231_p0 = scmp.ne.s32.totalorder %s2224_s9, 0 }
  0x5b   : > { %s320_s10 = sand.u32 (!%p2231_p0), 1, %s1958_s25  }
  0x5c   : > { %318 = sbr.rel (%p2231_p0) target bundleno = 742 (0x2e6), region = 48  ;;  %s1416_s13 = sshll.u32 (!%p2231_p0), %s320_s10, 3 }
  0x5d   : > { %s321_s15 = scalar_lea.sflag (!%p2231_p0), [#allocation4], %s320_s10  ;;  %s324_s14 = scalar_lea.vmem (!%p2231_p0), [#allocation3], %s1416_s13 }
  0x61   : > { %1941 = dma.done.wait (%p2126_p4), %s321_s15, 128  }
  0x62   : > { %1943 = vsyncadd (%p2126_p4), %s321_s15, 4294967168  ;;  %p2232_p2 = scmp.ne.s32.totalorder %s2223_s8, 0 }
  0x64   : > { %1945 = dma.done.wait (%p2232_p2), [#allocation6], 2112  }
  0x65   : > { %1947 = vsyncadd (%p2232_p2), [#allocation6], 4294965184 }
  0x66   : > { %1949 = dma.done.wait (%p2232_p2), [#allocation9], 10240  }
  0x67   : > { %1951 = vsyncadd (%p2232_p2), [#allocation9], 4294957056  ;;  %v1987_v0 = vmov 0   ;;  %v1648_v1 = vld [vmem:[#allocation5 + $0x64] ss:$16 sps:$4 sm:$0xff]   ;;  %vm486_vm0 = vcmask 523264  }
  0x68   : > { %522 = vmatprep.mubr.bf16.mxu1 %v1987_v0  ;;  %v1650_v2 = vld [vmem:[#allocation5 + $0x60] ss:$16 sps:$4 sm:$0xff]   ;;  %498 = vmatprep.subr.bf16.mxu1 %v1648_v1  ;;  %v1651_v3 = vld [vmem:[#allocation5 + $0x44] ss:$16 sps:$4 sm:$0xff]   ;;  %v1662_v10 = vld [vmem:[#allocation5 + $0x6c] ss:$16 sps:$4 sm:$0xff]  }
  0x69   : > { %499 = vmatpush1.bf16.msra.mxu1 %v1650_v2  ;;  %v1653_v4 = vld [vmem:[#allocation5 + $0x40] ss:$16 sps:$4 sm:$0xff]   ;;  %v1654_v5 = vld [vmem:[#allocation5 + $0x24] ss:$16 sps:$4 sm:$0xff]   ;;  %v1660_v15 = vld [vmem:[#allocation5 + $0x68] ss:$16 sps:$4 sm:$0xff]  }
  0x6a   : > { %500 = vmatprep.subr.bf16.mxu1 %v1651_v3  ;;  %v1656_v6 = vld [vmem:[#allocation5 + $0x20] ss:$16 sps:$4 sm:$0xff]   ;;  %v1657_v7 = vld [vmem:[#allocation5 + $0x4] ss:$16 sps:$4 sm:$0xff]   ;;  %v1665_v17 = vld [vmem:[#allocation5 + $0x4c] ss:$16 sps:$4 sm:$0xff]  }
  0x6b   : > { %v1659_v8 = vld [vmem:[#allocation5] ss:$16 sps:$4 sm:$0xff]   ;;  %v1674_v12 = vld [vmem:[#allocation8 + $0x70] ss:$8 sps:$4 sm:$0xff]   ;;  %v1677_v16 = vld [vmem:[#allocation8 + $0x60] ss:$8 sps:$4 sm:$0xff]  }
  0x6c   : > { %v388_v9 = vld [vmem:[%s324_s14] sm:$0xff]  ;;  %v1683_v23 = vld [vmem:[#allocation8 + $0x40] ss:$8 sps:$4 sm:$0xff]   ;;  %p371_p4 = scmp.lt.s32.totalorder %s1966_s27, 1 }
  0x6d   : > { %501 = vmatpush1.bf16.msra.mxu1 %v1653_v4  ;;  %v1672_v11 = vld [vmem:[#allocation8 + $0x74] ss:$8 sps:$4 sm:$0xff]   ;;  %v1675_v13 = vld [vmem:[#allocation8 + $0x64] ss:$8 sps:$4 sm:$0xff]   ;;  %v389_v14 = vpack.c.bf16 %v388_v9, %v388_v9  ;;  %v1680_v20 = vld [vmem:[#allocation8 + $0x50] ss:$8 sps:$4 sm:$0xff]  }
  0x6e   : > { %502 = vmatprep.subr.bf16.mxu1 %v1654_v5  ;;  %1025 = vmatprep.subr.bf16.mxu0 %v1672_v11  ;;  %v1678_v18 = vld [vmem:[#allocation8 + $0x54] ss:$8 sps:$4 sm:$0xff]   ;;  %v1681_v21 = vld [vmem:[#allocation8 + $0x44] ss:$8 sps:$4 sm:$0xff]   ;;  %v1668_v22 = vld [vmem:[#allocation5 + $0x2c] ss:$16 sps:$4 sm:$0xff]  }
  0x6f   : > { %1026 = vmatpush1.bf16.msra.mxu0 %v1674_v12  ;;  %v1663_v19 = vld [vmem:[#allocation5 + $0x48] ss:$16 sps:$4 sm:$0xff]   ;;  %v1671_v26 = vld [vmem:[#allocation5 + $0xc] ss:$16 sps:$4 sm:$0xff]   ;;  %s2241_s27 = smov (!%p371_p4, %s1966_s27), 1 }
  0x70   : > { %1027 = vmatprep.subr.bf16.mxu0 %v1675_v13  ;;  %v1666_v24 = vld [vmem:[#allocation5 + $0x28] ss:$16 sps:$4 sm:$0xff]   ;;  %v1689_v28 = vld [vmem:[#allocation8 + $0x30] ss:$8 sps:$4 sm:$0xff]   ;;  %v1695_v31 = vld [vmem:[#allocation8 + $0x20] ss:$8 sps:$4 sm:$0xff]  }
  0x71   : > { %503 = vmatpush1.bf16.msra.mxu1 %v1656_v6  ;;  %v1684_v25 = vld [vmem:[#allocation8 + $0x34] ss:$8 sps:$4 sm:$0xff]   ;;  %v1690_v29 = vld [vmem:[#allocation8 + $0x24] ss:$8 sps:$4 sm:$0xff]   ;;  %v1686_v32 = vld [vmem:[#allocation8 + $0x170] ss:$8 sps:$4 sm:$0xff]  }
  0x72   : > { %504 = vmatprep.subr.bf16.mxu1 %v1657_v7  ;;  %v1669_v27 = vld [vmem:[#allocation5 + $0x8] ss:$16 sps:$4 sm:$0xff]   ;;  %v1692_v35 = vld [vmem:[#allocation8 + $0x160] ss:$8 sps:$4 sm:$0xff]   ;;  %v1701_v36 = vld [vmem:[#allocation8 + $0x10] ss:$8 sps:$4 sm:$0xff]  }
  0x73   : > { %1028 = vmatpush1.bf16.msra.mxu0 %v1677_v16  ;;  %v1688_v30 = vld [vmem:[#allocation8 + $0x174] ss:$8 sps:$4 sm:$0xff]   ;;  %v1694_v34 = vld [vmem:[#allocation8 + $0x164] ss:$8 sps:$4 sm:$0xff]   ;;  %v1707_v39 = vld [vmem:[#allocation8] ss:$8 sps:$4 sm:$0xff]  }
  0x74   : > { %1029 = vmatprep.subr.bf16.mxu0 %v1678_v18  ;;  %v1696_v33 = vld [vmem:[#allocation8 + $0x14] ss:$8 sps:$4 sm:$0xff]   ;;  %v1702_v37 = vld [vmem:[#allocation8 + $0x4] ss:$8 sps:$4 sm:$0xff]   ;;  %v1698_v40 = vld [vmem:[#allocation8 + $0x150] ss:$8 sps:$4 sm:$0xff]  }
  0x75   : > { %505 = vmatpush1.bf16.msra.mxu1 %v1659_v8  ;;  %v1700_v38 = vld [vmem:[#allocation8 + $0x154] ss:$8 sps:$4 sm:$0xff]   ;;  %v1706_v42 = vld [vmem:[#allocation8 + $0x144] ss:$8 sps:$4 sm:$0xff]   ;;  %v1704_v43 = vld [vmem:[#allocation8 + $0x140] ss:$8 sps:$4 sm:$0xff]  }
  0x76   : > { %539 = vmatprep.subr.bf16.mxu1 %v1662_v10  ;;  %v1708_v41 = vld [vmem:[#allocation8 + $0xf4] ss:$8 sps:$4 sm:$0xff]   ;;  %v1713_v45 = vld [vmem:[#allocation8 + $0xf0] ss:$8 sps:$4 sm:$0xff]   ;;  %v1714_v46 = vld [vmem:[#allocation8 + $0xe4] ss:$8 sps:$4 sm:$0xff]  }
  0x77   : > { %1030 = vmatpush1.bf16.msra.mxu0 %v1680_v20  ;;  %v1712_v44 = vld [vmem:[#allocation8 + $0x134] ss:$8 sps:$4 sm:$0xff]   ;;  %v1719_v47 = vld [vmem:[#allocation8 + $0xe0] ss:$8 sps:$4 sm:$0xff]   ;;  %v1710_v48 = vld [vmem:[#allocation8 + $0x130] ss:$8 sps:$4 sm:$0xff]   ;;  %v589_v20 = vlaneseq }
  0x78   : > { %1438 = vmatmul.mubr.msk.bf16.vlgmr.msra.gmra.mxu1 %vm486_vm0, %v389_v14  ;;  %1031 = vmatprep.subr.bf16.mxu0 %v1681_v21  ;;  %v1720_v49 = vld [vmem:[#allocation8 + $0xd4] ss:$8 sps:$4 sm:$0xff]   ;;  %v1718_v50 = vld [vmem:[#allocation8 + $0x124] ss:$8 sps:$4 sm:$0xff]   ;;  %v1725_v51 = vld [vmem:[#allocation8 + $0xd0] ss:$8 sps:$4 sm:$0xff]  }
  0x79   : > { %540 = vmatpush1.bf16.msra.mxu1 %v1660_v15  ;;  %563 = vmatprep.mubr.bf16.mxu1 %v1987_v0  ;;  %v1716_v52 = vld [vmem:[#allocation8 + $0x120] ss:$8 sps:$4 sm:$0xff]   ;;  %v1726_v53 = vld [vmem:[#allocation8 + $0xc4] ss:$8 sps:$4 sm:$0xff]   ;;  %v1724_v54 = vld [vmem:[#allocation8 + $0x114] ss:$8 sps:$4 sm:$0xff]  }
  0x7a   : > { %541 = vmatprep.subr.bf16.mxu1 %v1665_v17  ;;  %v1731_v55 = vld [vmem:[#allocation8 + $0xc0] ss:$8 sps:$4 sm:$0xff]   ;;  %v1722_v56 = vld [vmem:[#allocation8 + $0x110] ss:$8 sps:$4 sm:$0xff]   ;;  %v1732_v57 = vld [vmem:[#allocation8 + $0xb4] ss:$8 sps:$4 sm:$0xff]  }
  0x7b   : > { %1032 = vmatpush1.bf16.msra.mxu0 %v1683_v23  ;;  %v1730_v58 = vld [vmem:[#allocation8 + $0x104] ss:$8 sps:$4 sm:$0xff]   ;;  %v1737_v59 = vld [vmem:[#allocation8 + $0xb0] ss:$8 sps:$4 sm:$0xff]   ;;  %v1728_v60 = vld [vmem:[#allocation8 + $0x100] ss:$8 sps:$4 sm:$0xff]  }
  0x7c   : > { %1033 = vmatprep.subr.bf16.mxu0 %v1684_v25  ;;  %v1738_v61 = vld [vmem:[#allocation8 + $0xa4] ss:$8 sps:$4 sm:$0xff]   ;;  %v1736_v62 = vld [vmem:[#allocation8 + $0x1f4] ss:$8 sps:$4 sm:$0xff]   ;;  %v1734_v63 = vld [vmem:[#allocation8 + $0x1f0] ss:$8 sps:$4 sm:$0xff]  }
  0x7d   : > { %542 = vmatpush1.bf16.msra.mxu1 %v1663_v19  ;;  %v1742_v0 = vld [vmem:[#allocation8 + $0x1e4] ss:$8 sps:$4 sm:$0xff]   ;;  %v1740_v1 = vld [vmem:[#allocation8 + $0x1e0] ss:$8 sps:$4 sm:$0xff]   ;;  %v1744_v3 = vld [vmem:[#allocation8 + $0x94] ss:$8 sps:$4 sm:$0xff]  }
  0x7e   : > { %543 = vmatprep.subr.bf16.mxu1 %v1668_v22  ;;  %v1743_v2 = vld [vmem:[#allocation8 + $0xa0] ss:$8 sps:$4 sm:$0xff]   ;;  %v1748_v4 = vld [vmem:[#allocation8 + $0x1d4] ss:$8 sps:$4 sm:$0xff]   ;;  %v1746_v5 = vld [vmem:[#allocation8 + $0x1d0] ss:$8 sps:$4 sm:$0xff]  }
  0x7f   : > { %1034 = vmatpush1.bf16.msra.mxu0 %v1689_v28  ;;  %v1749_v6 = vld [vmem:[#allocation8 + $0x90] ss:$8 sps:$4 sm:$0xff]   ;;  %v1750_v7 = vld [vmem:[#allocation8 + $0x84] ss:$8 sps:$4 sm:$0xff]   ;;  %v1752_v9 = vld [vmem:[#allocation8 + $0x1c0] ss:$8 sps:$4 sm:$0xff]  }
  0x80   : > { %1035 = vmatprep.subr.bf16.mxu0 %v1690_v29  ;;  %v1754_v8 = vld [vmem:[#allocation8 + $0x1c4] ss:$8 sps:$4 sm:$0xff]   ;;  %v1755_v10 = vld [vmem:[#allocation8 + $0x80] ss:$8 sps:$4 sm:$0xff]   ;;  %v1758_v11 = vld [vmem:[#allocation8 + $0x1b4] ss:$8 sps:$4 sm:$0xff]  }
  0x81   : > { %544 = vmatpush1.bf16.msra.mxu1 %v1666_v24  ;;  %v1756_v12 = vld [vmem:[#allocation8 + $0x1b0] ss:$8 sps:$4 sm:$0xff]   ;;  %v1761_v13 = vld [vmem:[#allocation8 + $0x1a4] ss:$8 sps:$4 sm:$0xff]   ;;  %v1764_v15 = vld [vmem:[#allocation8 + $0x194] ss:$8 sps:$4 sm:$0xff]  }
  0x82   : > { %545 = vmatprep.subr.bf16.mxu1 %v1671_v26  ;;  %v1762_v16 = vld [vmem:[#allocation8 + $0x190] ss:$8 sps:$4 sm:$0xff]   ;;  %v1767_v17 = vld [vmem:[#allocation8 + $0x184] ss:$8 sps:$4 sm:$0xff]   ;;  %v1765_v18 = vld [vmem:[#allocation8 + $0x180] ss:$8 sps:$4 sm:$0xff]  }
  0x83   : > { %1036 = vmatpush1.bf16.msra.mxu0 %v1695_v31  ;;  %v1768_v19 = vld [vmem:[#allocation10 + $0x78] sm:$0xff]   ;;  %v2168_v21 = vshrl.u32 %v589_v20, 7  ;;  %s1421_s9 = sshll.u32 %s2241_s27, 3 }
  0x84   : > { %1037 = vmatprep.subr.bf16.mxu0 %v1696_v33  ;;  %v587_v23 = vld [vmem:[#allocation7] sm:$0xf]  ;;  %s374_s20 = scalar_lea.vmem %s2218_s7, %s1421_s9 }
  0x85   : > { %546 = vmatpush1.bf16.msra.mxu1 %v1669_v27  ;;  %v591_v22 = vsub.s32 0, %v2168_v21  ;;  %v595_v24 = vsub.s32 1, %v2168_v21 }
  0x86   : > { %1066 = vmatprep.subr.bf16.mxu1 %v1688_v30 }
  0x87   : > { %1038 = vmatpush1.bf16.msra.mxu0 %v1701_v36  ;;  %v592_v25 = vrot.slane %v587_v23, %v591_v22  ;;  %v596_v26 = vrot.slane %v587_v23, %v595_v24 }
  0x88   : > { %1439 = vmatmul.mubr.msk.bf16.vlgmr.msra.gmra.mxu1 %vm486_vm0, %v389_v14  ;;  %1039 = vmatprep.subr.bf16.mxu0 %v1702_v37  ;;  %v1759_v14 = vld [vmem:[#allocation8 + $0x1a0] ss:$8 sps:$4 sm:$0xff]  }
  0x89   : > { %1067 = vmatpush1.bf16.msra.mxu1 %v1686_v32 }
  0x8a   : > { %1068 = vmatprep.subr.bf16.mxu1 %v1694_v34 }
  0x8b   : > { %1040 = vmatpush1.bf16.msra.mxu0 %v1707_v39 }
  0x8c   : > { %1041 = vmatprep.subr.bf16.mxu0 %v1708_v41  ;;  %v1770_v41 = vld [vmem:[#allocation10 + $0x70] sm:$0xff]  }
  0x8d   : > { %1069 = vmatpush1.bf16.msra.mxu1 %v1692_v35 }
  0x8e   : > { %1070 = vmatprep.subr.bf16.mxu1 %v1700_v38  ;;  %v1769_v38 = vld [vmem:[#allocation10 + $0x38] sm:$0xff]  }
  0x8f   : > { %1042 = vmatpush2.bf16.msra.mxu0 %v1713_v45 }
  0x90   : > { %1043 = vmatprep.subr.bf16.mxu0 %v1714_v46 }
  0x91   : > { %1071 = vmatpush1.bf16.msra.mxu1 %v1698_v40  ;;  %v599_v40 = vsub.s32 2, %v2168_v21 }
  0x92   : > { %1072 = vmatprep.subr.bf16.mxu1 %v1706_v42  ;;  %v603_v42 = vsub.s32 3, %v2168_v21 }
  0x93   : > { %1044 = vmatpush2.bf16.msra.mxu0 %v1719_v47 }
  0x94   : > { %1045 = vmatprep.subr.bf16.mxu0 %v1720_v49 }
  0x95   : > { %1073 = vmatpush1.bf16.msra.mxu1 %v1704_v43  ;;  %v600_v43 = vrot.slane %v587_v23, %v599_v40 }
  0x96   : > { %1074 = vmatprep.subr.bf16.mxu1 %v1712_v44  ;;  %v604_v44 = vrot.slane %v587_v23, %v603_v42 }
  0x97   : > { %1046 = vmatpush2.bf16.msra.mxu0 %v1725_v51 }
  0x98   : > { %1047 = vmatprep.subr.bf16.mxu0 %v1726_v53 }
  0x99   : > { %1075 = vmatpush1.bf16.msra.mxu1 %v1710_v48 }
  0x9a   : > { %1076 = vmatprep.subr.bf16.mxu1 %v1718_v50 }
  0x9b   : > { %1048 = vmatpush2.bf16.msra.mxu0 %v1731_v55 }
  0x9c   : > { %1049 = vmatprep.subr.bf16.mxu0 %v1732_v57  ;;  %v1771_v57 = vld [vmem:[#allocation10 + $0x30] sm:$0xff]  }
  0x9d   : > { %1077 = vmatpush1.bf16.msra.mxu1 %v1716_v52 }
  0x9e   : > { %1078 = vmatprep.subr.bf16.mxu1 %v1724_v54 }
  0x9f   : > { %1050 = vmatpush2.bf16.msra.mxu0 %v1737_v59  ;;  %v1773_v59 = vld [vmem:[#allocation10 + $0x28] sm:$0xff]  }
  0xa0   : > { %1051 = vmatprep.subr.bf16.mxu0 %v1738_v61  ;;  %v1775_v61 = vld [vmem:[#allocation10 + $0x20] sm:$0xff]  }
  0xa1   : > { %1079 = vmatpush1.bf16.msra.mxu1 %v1722_v56 }
  0xa2   : > { %1080 = vmatprep.subr.bf16.mxu1 %v1730_v58  ;;  %v1772_v58 = vld [vmem:[#allocation10 + $0x68] sm:$0xff]  }
  0xa3   : > { %1052 = vmatpush2.bf16.msra.mxu0 %v1743_v2  ;;  %v1780_v2 = vld [vmem:[#allocation10 + $0x48] sm:$0xff]  }
  0xa4   : > { %1053 = vmatprep.subr.bf16.mxu0 %v1744_v3  ;;  %v1781_v3 = vld [vmem:[#allocation10 + $0x8] sm:$0xff]  }
  0xa5   : > { %1081 = vmatpush1.bf16.msra.mxu1 %v1728_v60  ;;  %v1774_v60 = vld [vmem:[#allocation10 + $0x60] sm:$0xff]  }
  0xa6   : > { %1082 = vmatprep.subr.bf16.mxu1 %v1736_v62  ;;  %v1776_v62 = vld [vmem:[#allocation10 + $0x58] sm:$0xff]  }
  0xa7   : > { %1054 = vmatpush2.bf16.msra.mxu0 %v1749_v6 }
  0xa8   : > { %1055 = vmatprep.subr.bf16.mxu0 %v1750_v7 }
  0xa9   : > { %1083 = vmatpush2.bf16.msra.mxu1 %v1734_v63  ;;  %v1777_v63 = vld [vmem:[#allocation10 + $0x18] sm:$0xff]  }
  0xaa   : > { %1084 = vmatprep.subr.bf16.mxu1 %v1742_v0  ;;  %v1778_v0 = vld [vmem:[#allocation10 + $0x50] sm:$0xff]  }
  0xab   : > { %1056 = vmatpush2.bf16.msra.mxu0 %v1755_v10  ;;  %v693_v10 = vld [vmem:[%s2215_s4] sm:$0x3] }
  0xac   : > { %1523 = vmatprep.subr.bf16.mxu0 %v1768_v19 }
  0xad   : > { %1085 = vmatpush2.bf16.msra.mxu1 %v1740_v1  ;;  %v1779_v1 = vld [vmem:[#allocation10 + $0x10] sm:$0xff]  }
  0xae   : > { %1086 = vmatprep.subr.bf16.mxu1 %v1748_v4  ;;  %v1782_v4 = vld [vmem:[#allocation10 + $0x40] sm:$0xff]  }
  0xb1   : > { %1087 = vmatpush2.bf16.msra.mxu1 %v1746_v5  ;;  %v1783_v5 = vld [vmem:[#allocation10] sm:$0xff]  }
  0xb2   : > { %1088 = vmatprep.subr.bf16.mxu1 %v1754_v8 }
  0xb5   : > { %1089 = vmatpush2.bf16.msra.mxu1 %v1752_v9 }
  0xb6   : > { %1090 = vmatprep.subr.bf16.mxu1 %v1758_v11  ;;  %v698_v11 = vrot.slane %v693_v10, %v591_v22 }
  0xb9   : > { %1091 = vmatpush2.bf16.msra.mxu1 %v1756_v12  ;;  %v702_v12 = vrot.slane %v693_v10, %v595_v24  ;;  %v1504_v24 = vld [vmem:[%s2217_s6] ss:$0 sm:$0xff] }
  0xba   : > { %1092 = vmatprep.subr.bf16.mxu1 %v1761_v13 }
  0xbd   : > { %1093 = vmatpush2.bf16.msra.mxu1 %v1759_v14 }
  0xbe   : > { %1094 = vmatprep.subr.bf16.mxu1 %v1764_v15 }
  0xc1   : > { %1095 = vmatpush2.bf16.msra.mxu1 %v1762_v16 }
  0xc2   : > { %1096 = vmatprep.subr.bf16.mxu1 %v1767_v17 }
  0xc5   : > { %1097 = vmatpush2.bf16.msra.mxu1 %v1765_v18 }
 0x138   : > { %v524_v27 = vpop.f32.mrf.mxu1 }
 0x139   : > { %v609_v28 = vadd.f32 %v592_v25, %v524_v27 }
 0x13a   : > { %v526_v29 = vpop.f32.mrf.mxu1 }
 0x13b   : > { %vm613_vm1 = vcmp.gt.f32.partialorder %v609_v28, 0.0  ;;  %v617_v30 = vmul.f32 0.2, %v609_v28  ;;  %v610_v31 = vadd.f32 %v596_v26, %v526_v29 }
 0x13c   : > { %v528_v32 = vpop.f32.mrf.mxu1 }
 0x13d   : > { %vm614_vm2 = vcmp.gt.f32.partialorder %v610_v31, 0.0  ;;  %v618_v33 = vmul.f32 0.2, %v610_v31  ;;  %v621_v35 = vsel %vm613_vm1, %v609_v28, %v617_v30 }
 0x13e   : > { %v529_v34 = vpop.f32.mrf.mxu1  ;;  %v625_v39 = vpack.c.bf16 %v621_v35, %v621_v35 }
 0x13f   : > { %v622_v36 = vsel %vm614_vm2, %v610_v31, %v618_v33 }
 0x140   : > { %v626_v37 = vpack.c.bf16 %v622_v36, %v622_v36 }
 0x142   : > { %1057 = vmatprep.mubr.bf16.mxu0 %v626_v37 }
 0x143   : > { %1058 = vmatmul.mubr.bf16.vlgmr.msra.gmra.mxu0 %v625_v39 }
 0x144   : > { %1524 = vmatpush3.bf16.msra.mxu0 %v1769_v38 }
 0x145   : > { %1525 = vmatprep.subr.bf16.mxu0 %v1770_v41 }
 0x148   : > { %v565_v45 = vpop.f32.mrf.mxu1  ;;  %1526 = vmatpush3.bf16.msra.mxu0 %v1771_v57 }
 0x149   : > { %v611_v46 = vadd.f32 %v600_v43, %v565_v45  ;;  %1527 = vmatprep.subr.bf16.mxu0 %v1772_v58 }
 0x14a   : > { %v567_v47 = vpop.f32.mrf.mxu1 }
 0x14b   : > { %vm615_vm3 = vcmp.gt.f32.partialorder %v611_v46, 0.0  ;;  %v619_v48 = vmul.f32 0.2, %v611_v46  ;;  %v612_v49 = vadd.f32 %v604_v44, %v567_v47 }
 0x14c   : > { %v569_v50 = vpop.f32.mrf.mxu1  ;;  %1528 = vmatpush3.bf16.msra.mxu0 %v1773_v59 }
 0x14d   : > { %vm616_vm4 = vcmp.gt.f32.partialorder %v612_v49, 0.0  ;;  %v620_v51 = vmul.f32 0.2, %v612_v49  ;;  %v623_v52 = vsel %vm615_vm3, %v611_v46, %v619_v48  ;;  %1529 = vmatprep.subr.bf16.mxu0 %v1774_v60 }
 0x14e   : > { %v570_v53 = vpop.f32.mrf.mxu1  ;;  %v627_v56 = vpack.c.bf16 %v623_v52, %v623_v52 }
 0x14f   : > { %v624_v54 = vsel %vm616_vm4, %v612_v49, %v620_v51 }
 0x150   : > { %v628_v55 = vpack.c.bf16 %v624_v54, %v624_v54  ;;  %1530 = vmatpush3.bf16.msra.mxu0 %v1775_v61 }
 0x151   : > { %1531 = vmatprep.subr.bf16.mxu0 %v1776_v62 }
 0x152   : > { %1098 = vmatprep.mubr.bf16.mxu1 %v628_v55 }
 0x153   : > { %1099 = vmatmul.mubr.bf16.vlgmr.msra.gmra.mxu1 %v627_v56 }
 0x154   : > { %1532 = vmatpush3.bf16.msra.mxu0 %v1777_v63 }
 0x155   : > { %1533 = vmatprep.subr.bf16.mxu0 %v1778_v0 }
 0x158   : > { %1534 = vmatpush3.bf16.msra.mxu0 %v1779_v1 }
 0x159   : > { %1535 = vmatprep.subr.bf16.mxu0 %v1780_v2 }
 0x15c   : > { %1536 = vmatpush3.bf16.msra.mxu0 %v1781_v3 }
 0x15d   : > { %1537 = vmatprep.subr.bf16.mxu0 %v1782_v4 }
 0x160   : > { %1538 = vmatpush3.bf16.msra.mxu0 %v1783_v5 }
 0x203   : > { %v1059_v6 = vpop.f32.mrf.mxu0 }
 0x204   : > { %v1060_v13 = vadd.f32 %v1059_v6, %v698_v11 }
 0x205   : > { %v1061_v7 = vpop.f32.mrf.mxu0 }
 0x206   : > { %v1062_v15 = vadd.f32 %v1061_v7, %v702_v12 }
 0x207   : > { %v1063_v8 = vpop.f32.mrf.mxu0 }
 0x209   : > { %v1064_v9 = vpop.f32.mrf.mxu0 }
 0x213   : > { %v1100_v14 = vpop.f32.mrf.mxu1 }
 0x214   : > { %v1101_v16 = vadd.f32 %v1100_v14, %v1060_v13 }
 0x215   : > { %v1102_v17 = vpop.f32.mrf.mxu1 }
 0x216   : > { %vm1107_vm5 = vcmp.gt.f32.partialorder %v1101_v16, 0.0  ;;  %v1109_v18 = vmul.f32 0.2, %v1101_v16  ;;  %v1103_v19 = vadd.f32 %v1102_v17, %v1062_v15 }
 0x217   : > { %v1104_v20 = vpop.f32.mrf.mxu1 }
 0x218   : > { %vm1108_vm6 = vcmp.gt.f32.partialorder %v1103_v19, 0.0  ;;  %v1110_v23 = vmul.f32 0.2, %v1103_v19  ;;  %v1111_v25 = vsel %vm1107_vm5, %v1101_v16, %v1109_v18 }
 0x219   : > { %v1105_v26 = vpop.f32.mrf.mxu1  ;;  %v1113_v28 = vpack.c.bf16 %v1111_v25, %v1111_v25 }
 0x21a   : > { %v1112_v27 = vsel %vm1108_vm6, %v1103_v19, %v1110_v23 }
 0x21b   : > { %v1114_v22 = vpack.c.bf16 %v1112_v27, %v1112_v27 }
 0x21d   : > { %1282 = vmatprep.mubr.bf16.mxu0 %v1114_v22 }
 0x21e   : > { %1283 = vmatmul.mubr.bf16.vlgmr.msra.gmra.mxu0 %v1113_v28 }
 0x2de   : > { %v1539_v21 = vpop.f32.mrf.mxu0 }
 0x2e0   : > { %v1540_v29 = vpop.f32.mrf.mxu0 }
 0x2e1   : > { %v1541_v30 = vadd.f32 %v1540_v29, %v1539_v21 }
 0x2e2   : > { %v1542_v31 = vpop.f32.mrf.mxu0 }
 0x2e3   : > { %v1285_v32 = vadd.f32 %v1541_v30, %v1504_v24 }
 0x2e4   : > { %v1543_v33 = vpop.f32.mrf.mxu0 }
 0x2e5   : > { %1290 = vst [vmem:[%s374_s20] sm:$0xff] %v1285_v32 }
 0x2e6 PF: > { %s22_s29 = sadd.s32 1, %s1974_s29   ;;  %s2233_s24 = smov %s1958_s25 }
 0x2e7   : > { %p19_p5 = scmp.ge.s32.totalorder %s22_s29, 4   ;;  %s2234_s25 = smov %s1962_s26 }
 0x2e8   : > { %s2235_s26 = smov %s2135_s16  ;;  %s2236_s27 = smov %s1970_s28 }
 0x2e9   : > { %s2237_s28 = smov %s2239_s23  ;;  %21 = sbr.rel (!%p19_p5) target bundleno = 8 (0x8), region = 113 }
 0x2ee   :  { %1310 = vsyncpa [#allocation4], 1 }
 0x2ef   :  { %1312 = vsyncpa [#allocation4 + $0x1], 1 }
 0x2f0   :  { %1313 = vsyncpa [#allocation6], 1 }
 0x2f1   :  { %1314 = vsyncpa [#allocation9], 1 }

</bundles_post_ra>
